<compile_context>
chip_gen: v7x
topology: tpu7x:2x2x1
jax: 0.10.0
libtpu: 0.0.40
codegen_flags: <defaults>
</compile_context>

<pallas_src>
import jax
import jax.numpy as jnp
from jax import lax
from jax.experimental import pallas as pl
from jax.experimental.pallas import tpu as pltpu


# ----------------------------------------------------------------------------
# Kernel
# ----------------------------------------------------------------------------
def fisher_gan_kernel(z_ref,
                      gw1_ref, gb1_ref, gw2_ref, gb2_ref,
                      dw1_ref, db1_ref, dw2t_ref, db2t_ref,
                      img_ref, p_ref):
    """Fused G (z -> image) + D (image -> P(generated)) for one batch tile."""
    cdt = gw1_ref.dtype                 # MXU operand dtype (bf16)
    out_dim = p_ref.shape[1]            # D output width (1 for FisherGAN)

    # ---- Generator: z -> image ----
    z = z_ref[...].astype(cdt)          # no-op: z is pre-cast in the wrapper
    h_g = jnp.dot(z, gw1_ref[...], preferred_element_type=jnp.float32) + gb1_ref[...]
    h_g = jnp.maximum(h_g, 0.0)                                     # ReLU
    img = jnp.dot(h_g.astype(cdt), gw2_ref[...],
                  preferred_element_type=jnp.float32) + gb2_ref[...]
    img = jax.nn.sigmoid(img)                                       # sigmoid
    img_ref[...] = img.astype(img_ref.dtype)                        # lane-dense store

    # ---- Discriminator: image -> P(generated) ----
    h_d = jnp.dot(img.astype(cdt), dw1_ref[...],
                  preferred_element_type=jnp.float32) + db1_ref[...]
    h_d = jnp.maximum(h_d, 0.0)                                     # ReLU

    # Head computed with the batch in the LANE dim: (8, hidden) x (tb, hidden)^T
    # -> (8, tb)  (q@k^T-style dot_general, contracting both minor dims).
    # Row r of dw2t holds D-head output unit r; rows >= out_dim are zero.
    logits_t = lax.dot_general(
        dw2t_ref[...], h_d.astype(cdt),
        dimension_numbers=(((1,), (1,)), ((), ())),
        preferred_element_type=jnp.float32) + db2t_ref[...]         # (8, tb) f32

    # Lane-dense p store: (1, out_dim, tb) block -> 4 B/row of HBM writeback
    # instead of the old 128-lane zero-padded (tb, 128) f32 block.
    p_ref[...] = jax.nn.sigmoid(logits_t[0:out_dim, :]).reshape(p_ref.shape)


# ----------------------------------------------------------------------------
# Wrapper helpers
# ----------------------------------------------------------------------------
def _vmem_caps():
    """(budget, max_tile, default_scoped_limit, vmem_limit_cap) for this chip."""
    cap = 64 << 20                                  # conservative fallback (v7x-class)
    try:
        cap = int(pltpu.get_tpu_info().vmem_capacity_bytes)
    except Exception:
        pass
    if cap >= (100 << 20):                          # v5e / v6e: 128 MiB VMEM
        budget, max_tile = 96 << 20, 2048
        default_scoped = 16 << 20                   # v5e default scoped limit (safe for v6e too)
        limit_cap = min(100 << 20, cap - (12 << 20))
    else:                                           # v7x-class: 64 MiB per TensorCore
        budget, max_tile = 44 << 20, 1024
        default_scoped = 32 << 20
        limit_cap = min(52 << 20, cap - (12 << 20))
    return budget, max_tile, default_scoped, limit_cap


def _pick_batch_tile(batch, per_row_bytes, resident_bytes, budget, max_tile):
    """Largest multiple-of-8 batch tile that fits the generation-aware budget.

    `resident_bytes` must already include the 2x double-buffering of the
    constant-index weight blocks.
    """
    avail = max(budget - resident_bytes, 1 << 20)
    tb = int(min(avail // max(per_row_bytes, 1), max_tile, max(batch, 1)))
    tb = max((tb // 8) * 8, 8)
    # Megacore: keep at least 2 "parallel" grid steps for non-trivial batches
    # so both TensorCores get work on v7x.
    if batch >= 16 and tb >= batch:
        tb = max(8, ((-(-batch // 2)) + 7) // 8 * 8)
    return tb


def prepare_params(params, compute_dtype=jnp.bfloat16):
    """One-time weight prep (hoisted out of the per-forward path).

    Casts matmul weights to the MXU operand dtype, keeps biases in f32, and
    pre-transposes/pads D's head to (8, hidden) so the kernel can put the batch
    in the lane dimension for the p output.
    """
    gw1, gb1, gw2, gb2, dw1, db1, dw2, db2 = params
    hidden, out_dim = dw2.shape
    assert out_dim <= 8, "FisherGAN D head wider than 8 not supported by this kernel"
    wdt = jnp.dtype(compute_dtype)

    dw2t = jnp.zeros((8, hidden), wdt).at[:out_dim, :].set(dw2.T.astype(wdt))
    db2t = jnp.zeros((8, 1), jnp.float32).at[:out_dim, 0].set(
        db2.reshape(-1).astype(jnp.float32))

    arrays = (gw1.astype(wdt), gb1.astype(jnp.float32),
              gw2.astype(wdt), gb2.astype(jnp.float32),
              dw1.astype(wdt), db1.astype(jnp.float32),
              dw2t, db2t)
    return arrays, int(out_dim)


def fisher_gan_forward(z, prepared, *, tile_batch=None):
    """Forward pass D(G(z)).  `prepared` comes from prepare_params() (call once)."""
    arrays, out_dim = prepared
    gw1, gb1, gw2, gb2, dw1, db1, dw2t, db2t = arrays
    cdt = gw1.dtype
    B, z_dim = z.shape
    hidden = gw1.shape[1]
    image_size = gw2.shape[1]

    budget, max_tile, default_scoped, limit_cap = _vmem_caps()

    # Resident weights allocate 2 buffers each even with a constant index_map.
    weight_bytes = sum(int(a.size) * a.dtype.itemsize for a in arrays)
    resident_bytes = 2 * weight_bytes
    # Per batch-row VMEM: double-buffered in/out blocks + live f32 intermediates.
    io_row = z_dim * jnp.dtype(cdt).itemsize + 4 * image_size + 4 * out_dim
    live_row = 4 * (2 * hidden + image_size + 16)
    per_row = 2 * io_row + live_row

    if tile_batch is None:
        tb = _pick_batch_tile(B, per_row, resident_bytes, budget, max_tile)
    else:
        tb = max(8, (min(int(tile_batch), max(B, 8)) // 8) * 8)

    num_tiles = pl.cdiv(B, tb)
    b_padded = num_tiles * tb

    # Pre-cast z once (halves input DMA; in-kernel cast becomes a no-op).
    z_in = z.astype(cdt)
    if b_padded != B:
        z_in = jnp.zeros((b_padded, z_dim), cdt).at[:B].set(z_in)

    def batch_tiled(feat):
        return pl.BlockSpec((tb, feat), lambda i: (i, 0))

    def resident(a):
        # DMA'd once, VMEM-resident across grid steps (constant block index).
        return pl.BlockSpec(a.shape, lambda i: (0,) * a.ndim)

    in_specs = [batch_tiled(z_dim)] + [resident(a) for a in arrays]
    out_specs = (
        batch_tiled(image_size),                                   # img: (tb, image_size)
        pl.BlockSpec((1, out_dim, tb), lambda i: (i, 0, 0)),       # p:  lane-dense row block
    )
    out_shape = (
        jax.ShapeDtypeStruct((b_padded, image_size), jnp.float32),
        jax.ShapeDtypeStruct((num_tiles, out_dim, tb), jnp.float32),
    )

    # Set the scoped VMEM limit whenever the estimate exceeds this generation's
    # default, and cap it with headroom below physical VMEM.
    est_vmem = resident_bytes + tb * per_row + (2 << 20)
    vmem_limit = None
    if est_vmem > default_scoped:
        vmem_limit = int(min(limit_cap, max(est_vmem + (4 << 20), est_vmem * 5 // 4)))

    img, p3 = pl.pallas_call(
        fisher_gan_kernel,
        grid=(num_tiles,),
        in_specs=in_specs,
        out_specs=out_specs,
        out_shape=out_shape,
        compiler_params=pltpu.CompilerParams(
            # Independent batch tiles -> dual-TC sharding on v7x megacore.
            dimension_semantics=("parallel",),
            vmem_limit_bytes=vmem_limit),
    )(z_in, *arrays)

    # Un-transpose p: (num_tiles, out_dim, tb) -> (B, out_dim).
    p = jnp.transpose(p3, (0, 2, 1)).reshape(b_padded, out_dim)[:B]
    return img[:B], p


# ----------------------------------------------------------------------------
# Parameter init + references
# ----------------------------------------------------------------------------
def init_params(key, z_dim, hidden_dim, image_size, output_dim):
    ks = jax.random.split(key, 4)
    gw1 = jax.random.normal(ks[0], (z_dim, hidden_dim), jnp.float32) * 0.1
    gb1 = jnp.zeros((1, hidden_dim), jnp.float32)
    gw2 = jax.random.normal(ks[1], (hidden_dim, image_size), jnp.float32) * 0.1
    gb2 = jnp.zeros((1, image_size), jnp.float32)
    dw1 = jax.random.normal(ks[2], (image_size, hidden_dim), jnp.float32) * 0.1
    db1 = jnp.zeros((1, hidden_dim), jnp.float32)
    dw2 = jax.random.normal(ks[3], (hidden_dim, output_dim), jnp.float32) * 0.1
    db2 = jnp.zeros((1, output_dim), jnp.float32)
    return (gw1, gb1, gw2, gb2, dw1, db1, dw2, db2)


def reference_forward_f32(z, params):
    gw1, gb1, gw2, gb2, dw1, db1, dw2, db2 = params
    h = jnp.maximum(z @ gw1 + gb1, 0.0)
    img = jax.nn.sigmoid(h @ gw2 + gb2)
    hd = jnp.maximum(img @ dw1 + db1, 0.0)
    p = jax.nn.sigmoid(hd @ dw2 + db2)
    return img, p


def reference_forward_matched(z, params, compute_dtype=jnp.bfloat16):
    """Same math as the kernel: bf16 matmul operands, f32 accumulation."""
    gw1, gb1, gw2, gb2, dw1, db1, dw2, db2 = params
    dt = jnp.dtype(compute_dtype)

    def mm(a, w):
        return jnp.dot(a.astype(dt), w.astype(dt), preferred_element_type=jnp.float32)

    h = jnp.maximum(mm(z, gw1) + gb1, 0.0)
    img = jax.nn.sigmoid(mm(h, gw2) + gb2)
    hd = jnp.maximum(mm(img, dw1) + db1, 0.0)
    p = jax.nn.sigmoid(mm(hd, dw2) + db2)
    return img, p


if __name__ == "__main__":
    # Small shapes: batch=32, z_dim=8, hidden=32, image_shape=(1,16,16)->256, output_dim=1
    B, Z_DIM, HIDDEN, OUT_DIM = 32, 8, 32, 1
    IMAGE_SHAPE = (1, 16, 16)
    IMAGE_SIZE = IMAGE_SHAPE[0] * IMAGE_SHAPE[1] * IMAGE_SHAPE[2]

    key = jax.random.PRNGKey(0)
    k_z, k_p = jax.random.split(key)
    z = jax.random.normal(k_z, (B, Z_DIM), jnp.float32)
    params = init_params(k_p, Z_DIM, HIDDEN, IMAGE_SIZE, OUT_DIM)

    # One-time weight prep hoisted out of the forward path.
    prepared = prepare_params(params)

    # tile_batch=8 -> grid=(4,): exercises the batch pipeline + parallel axis.
    img, p = fisher_gan_forward(z, prepared, tile_batch=8)
    jax.block_until_ready((img, p))

    img_m, p_m = reference_forward_matched(z, params)
    img_f, p_f = reference_forward_f32(z, params)

    assert img.shape == (B, IMAGE_SIZE) and p.shape == (B, OUT_DIM)
    # Tight check vs. a reference using the same bf16-operand / f32-accum matmuls.
    assert jnp.allclose(img, img_m, atol=2e-3, rtol=2e-3), float(jnp.max(jnp.abs(img - img_m)))
    assert jnp.allclose(p, p_m, atol=2e-3, rtol=2e-3), float(jnp.max(jnp.abs(p - p_m)))
    # Loose check vs. the pure-f32 (PyTorch-equivalent) forward.
    assert jnp.allclose(img, img_f, atol=5e-2), float(jnp.max(jnp.abs(img - img_f)))
    assert jnp.allclose(p, p_f, atol=5e-2), float(jnp.max(jnp.abs(p - p_f)))

    # Also exercise the generation-aware auto tile picker once.
    img2, p2 = fisher_gan_forward(z, prepared)
    jax.block_until_ready((img2, p2))
    assert jnp.allclose(img2, img, atol=1e-5) and jnp.allclose(p2, p, atol=1e-5)

    print("KERNEL_OK")
</pallas_src>

<mosaic_0001>
module attributes {stable_mosaic.version = 11 : i64} {
  func.func @fisher_gan_kernel(%arg0: i32, %arg1: memref<8x8xbf16, #tpu.memory_space<vmem>>, %arg2: memref<8x32xbf16, #tpu.memory_space<vmem>>, %arg3: memref<1x32xf32, #tpu.memory_space<vmem>>, %arg4: memref<32x256xbf16, #tpu.memory_space<vmem>>, %arg5: memref<1x256xf32, #tpu.memory_space<vmem>>, %arg6: memref<256x32xbf16, #tpu.memory_space<vmem>>, %arg7: memref<1x32xf32, #tpu.memory_space<vmem>>, %arg8: memref<8x32xbf16, #tpu.memory_space<vmem>>, %arg9: memref<8x1xf32, #tpu.memory_space<vmem>>, %arg10: memref<8x256xf32, #tpu.memory_space<vmem>>, %arg11: memref<1x1x8xf32, #tpu.memory_space<vmem>>) attributes {dimension_semantics = [#tpu.dimension_semantics<parallel>], iteration_bounds = array<i64: 4>, scalar_prefetch = 0 : i64, scratch_operands = 0 : i64, tpu.core_type = #tpu.core_type<tc>, window_params = [{transform_indices = @transform_0, window_bounds = array<i64: 8, 8>}, {pipeline_mode = #tpu.pipeline_mode<synchronous>, transform_indices = @transform_1, window_bounds = array<i64: 8, 32>}, {pipeline_mode = #tpu.pipeline_mode<synchronous>, transform_indices = @transform_2, window_bounds = array<i64: 1, 32>}, {pipeline_mode = #tpu.pipeline_mode<synchronous>, transform_indices = @transform_3, window_bounds = array<i64: 32, 256>}, {pipeline_mode = #tpu.pipeline_mode<synchronous>, transform_indices = @transform_4, window_bounds = array<i64: 1, 256>}, {pipeline_mode = #tpu.pipeline_mode<synchronous>, transform_indices = @transform_5, window_bounds = array<i64: 256, 32>}, {pipeline_mode = #tpu.pipeline_mode<synchronous>, transform_indices = @transform_6, window_bounds = array<i64: 1, 32>}, {pipeline_mode = #tpu.pipeline_mode<synchronous>, transform_indices = @transform_7, window_bounds = array<i64: 8, 32>}, {pipeline_mode = #tpu.pipeline_mode<synchronous>, transform_indices = @transform_8, window_bounds = array<i64: 8, 1>}, {transform_indices = @transform_9, window_bounds = array<i64: 8, 256>}, {transform_indices = @transform_10, window_bounds = array<i64: 1, 1, 8>}]} {
    %c0 = arith.constant 0 : index
    %c0_0 = arith.constant 0 : index
    %0 = vector.load %arg1[%c0, %c0_0] : memref<8x8xbf16, #tpu.memory_space<vmem>>, vector<8x8xbf16>
    %c0_1 = arith.constant 0 : index
    %c0_2 = arith.constant 0 : index
    %1 = vector.load %arg2[%c0_1, %c0_2] : memref<8x32xbf16, #tpu.memory_space<vmem>>, vector<8x32xbf16>
    %cst = arith.constant dense<0.000000e+00> : vector<8x32xf32>
    %2 = tpu.matmul %0, %1, %cst {dimension_numbers = #tpu.dot_dimension_numbers<[1], [0], [0], [1], [0, 0, 1, 1], [], []>} : vector<8x8xbf16>, vector<8x32xbf16>, vector<8x32xf32> -> vector<8x32xf32>
    %c0_3 = arith.constant 0 : index
    %c0_4 = arith.constant 0 : index
    %3 = vector.load %arg3[%c0_3, %c0_4] : memref<1x32xf32, #tpu.memory_space<vmem>>, vector<1x32xf32>
    %4 = vector.broadcast %3 : vector<1x32xf32> to vector<8x32xf32>
    %5 = arith.addf %2, %4 : vector<8x32xf32>
    %cst_5 = arith.constant 0.000000e+00 : f32
    %6 = vector.broadcast %cst_5 : f32 to vector<8x32xf32>
    %7 = arith.maximumf %5, %6 : vector<8x32xf32>
    %8 = arith.truncf %7 : vector<8x32xf32> to vector<8x32xbf16>
    %c0_6 = arith.constant 0 : index
    %c0_7 = arith.constant 0 : index
    %9 = vector.load %arg4[%c0_6, %c0_7] : memref<32x256xbf16, #tpu.memory_space<vmem>>, vector<32x256xbf16>
    %cst_8 = arith.constant dense<0.000000e+00> : vector<8x256xf32>
    %10 = tpu.matmul %8, %9, %cst_8 {dimension_numbers = #tpu.dot_dimension_numbers<[1], [0], [0], [1], [0, 0, 1, 1], [], []>} : vector<8x32xbf16>, vector<32x256xbf16>, vector<8x256xf32> -> vector<8x256xf32>
    %c0_9 = arith.constant 0 : index
    %c0_10 = arith.constant 0 : index
    %11 = vector.load %arg5[%c0_9, %c0_10] : memref<1x256xf32, #tpu.memory_space<vmem>>, vector<1x256xf32>
    %12 = vector.broadcast %11 : vector<1x256xf32> to vector<8x256xf32>
    %13 = arith.addf %10, %12 : vector<8x256xf32>
    %14 = arith.negf %13 : vector<8x256xf32>
    %15 = math.exp %14 : vector<8x256xf32>
    %cst_11 = arith.constant 1.000000e+00 : f32
    %16 = vector.broadcast %cst_11 : f32 to vector<8x256xf32>
    %17 = arith.addf %16, %15 : vector<8x256xf32>
    %18 = arith.divf %16, %17 : vector<8x256xf32>
    %c0_12 = arith.constant 0 : index
    %c0_13 = arith.constant 0 : index
    %19 = vector.load %arg10[%c0_12, %c0_13] : memref<8x256xf32, #tpu.memory_space<vmem>>, vector<8x256xf32>
    tpu.vector_store %arg10[%c0_12, %c0_13], %18 {strides = array<i32>} : memref<8x256xf32, #tpu.memory_space<vmem>>, vector<8x256xf32>,
    %20 = arith.truncf %18 : vector<8x256xf32> to vector<8x256xbf16>
    %c0_14 = arith.constant 0 : index
    %c0_15 = arith.constant 0 : index
    %21 = vector.load %arg6[%c0_14, %c0_15] : memref<256x32xbf16, #tpu.memory_space<vmem>>, vector<256x32xbf16>
    %cst_16 = arith.constant dense<0.000000e+00> : vector<8x32xf32>
    %22 = tpu.matmul %20, %21, %cst_16 {dimension_numbers = #tpu.dot_dimension_numbers<[1], [0], [0], [1], [0, 0, 1, 1], [], []>} : vector<8x256xbf16>, vector<256x32xbf16>, vector<8x32xf32> -> vector<8x32xf32>
    %c0_17 = arith.constant 0 : index
    %c0_18 = arith.constant 0 : index
    %23 = vector.load %arg7[%c0_17, %c0_18] : memref<1x32xf32, #tpu.memory_space<vmem>>, vector<1x32xf32>
    %24 = vector.broadcast %23 : vector<1x32xf32> to vector<8x32xf32>
    %25 = arith.addf %22, %24 : vector<8x32xf32>
    %cst_19 = arith.constant 0.000000e+00 : f32
    %26 = vector.broadcast %cst_19 : f32 to vector<8x32xf32>
    %27 = arith.maximumf %25, %26 : vector<8x32xf32>
    %c0_20 = arith.constant 0 : index
    %c0_21 = arith.constant 0 : index
    %28 = vector.load %arg8[%c0_20, %c0_21] : memref<8x32xbf16, #tpu.memory_space<vmem>>, vector<8x32xbf16>
    %29 = arith.truncf %27 : vector<8x32xf32> to vector<8x32xbf16>
    %cst_22 = arith.constant dense<0.000000e+00> : vector<8x8xf32>
    %30 = tpu.matmul %28, %29, %cst_22 {dimension_numbers = #tpu.dot_dimension_numbers<[1], [1], [0], [0], [0, 0, 1, 0], [], []>} : vector<8x32xbf16>, vector<8x32xbf16>, vector<8x8xf32> -> vector<8x8xf32>
    %c0_23 = arith.constant 0 : index
    %c0_24 = arith.constant 0 : index
    %31 = vector.load %arg9[%c0_23, %c0_24] : memref<8x1xf32, #tpu.memory_space<vmem>>, vector<8x1xf32>
    %32 = vector.broadcast %31 : vector<8x1xf32> to vector<8x8xf32>
    %33 = arith.addf %30, %32 : vector<8x8xf32>
    %34 = vector.extract_strided_slice %33 {offsets = [0, 0], sizes = [1, 8], strides = [1, 1]} : vector<8x8xf32> to vector<1x8xf32>
    %35 = arith.negf %34 : vector<1x8xf32>
    %36 = math.exp %35 : vector<1x8xf32>
    %cst_25 = arith.constant 1.000000e+00 : f32
    %37 = vector.broadcast %cst_25 : f32 to vector<1x8xf32>
    %38 = arith.addf %37, %36 : vector<1x8xf32>
    %39 = arith.divf %37, %38 : vector<1x8xf32>
    %40 = vector.shape_cast %39 : vector<1x8xf32> to vector<1x1x8xf32>
    %c0_26 = arith.constant 0 : index
    %c0_27 = arith.constant 0 : index
    %c0_28 = arith.constant 0 : index
    %41 = vector.load %arg11[%c0_26, %c0_27, %c0_28] : memref<1x1x8xf32, #tpu.memory_space<vmem>>, vector<1x1x8xf32>
    tpu.vector_store %arg11[%c0_26, %c0_27, %c0_28], %40 {strides = array<i32>} : memref<1x1x8xf32, #tpu.memory_space<vmem>>, vector<1x1x8xf32>,
    return
  }
  func.func @transform_0(%arg0: i32) -> (i32, i32) {
    %c0_i32 = arith.constant 0 : i32
    %c0_i32_0 = arith.constant 0 : i32
    return %arg0, %c0_i32 : i32, i32
  }
  func.func @transform_1(%arg0: i32) -> (i32, i32) {
    %c0_i32 = arith.constant 0 : i32
    %c0_i32_0 = arith.constant 0 : i32
    %c0_i32_1 = arith.constant 0 : i32
    return %c0_i32, %c0_i32_0 : i32, i32
  }
  func.func @transform_2(%arg0: i32) -> (i32, i32) {
    %c0_i32 = arith.constant 0 : i32
    %c0_i32_0 = arith.constant 0 : i32
    %c0_i32_1 = arith.constant 0 : i32
    return %c0_i32, %c0_i32_0 : i32, i32
  }
  func.func @transform_3(%arg0: i32) -> (i32, i32) {
    %c0_i32 = arith.constant 0 : i32
    %c0_i32_0 = arith.constant 0 : i32
    %c0_i32_1 = arith.constant 0 : i32
    return %c0_i32, %c0_i32_0 : i32, i32
  }
  func.func @transform_4(%arg0: i32) -> (i32, i32) {
    %c0_i32 = arith.constant 0 : i32
    %c0_i32_0 = arith.constant 0 : i32
    %c0_i32_1 = arith.constant 0 : i32
    return %c0_i32, %c0_i32_0 : i32, i32
  }
  func.func @transform_5(%arg0: i32) -> (i32, i32) {
    %c0_i32 = arith.constant 0 : i32
    %c0_i32_0 = arith.constant 0 : i32
    %c0_i32_1 = arith.constant 0 : i32
    return %c0_i32, %c0_i32_0 : i32, i32
  }
  func.func @transform_6(%arg0: i32) -> (i32, i32) {
    %c0_i32 = arith.constant 0 : i32
    %c0_i32_0 = arith.constant 0 : i32
    %c0_i32_1 = arith.constant 0 : i32
    return %c0_i32, %c0_i32_0 : i32, i32
  }
  func.func @transform_7(%arg0: i32) -> (i32, i32) {
    %c0_i32 = arith.constant 0 : i32
    %c0_i32_0 = arith.constant 0 : i32
    %c0_i32_1 = arith.constant 0 : i32
    return %c0_i32, %c0_i32_0 : i32, i32
  }
  func.func @transform_8(%arg0: i32) -> (i32, i32) {
    %c0_i32 = arith.constant 0 : i32
    %c0_i32_0 = arith.constant 0 : i32
    %c0_i32_1 = arith.constant 0 : i32
    return %c0_i32, %c0_i32_0 : i32, i32
  }
  func.func @transform_9(%arg0: i32) -> (i32, i32) {
    %c0_i32 = arith.constant 0 : i32
    %c0_i32_0 = arith.constant 0 : i32
    return %arg0, %c0_i32 : i32, i32
  }
  func.func @transform_10(%arg0: i32) -> (i32, i32, i32) {
    %c0_i32 = arith.constant 0 : i32
    %c0_i32_0 = arith.constant 0 : i32
    %c0_i32_1 = arith.constant 0 : i32
    return %arg0, %c0_i32, %c0_i32_0 : i32, i32, i32
  }
}

</mosaic_0001>

<bundles_post_ra>
// kernel: tpu_custom_call.1
= control target key start
LH: loop header
LB: loop body
LE: loop exit
PB: predicated region body
PF: predicated region fallthrough
CT: control target
= control target key end

     0   :  { %s1408_s0 = inlined_call_operand.vmem [shape: bf16[32,8], index: 0, kind: input, shape index: {}]   ;;  %s1409_s1 = inlined_call_operand.vmem [shape: bf16[8,32], index: 1, kind: input, shape index: {}]   ;;  %s1410_s2 = inlined_call_operand.vmem [shape: f32[1,32], index: 2, kind: input, shape index: {}]   ;;  %s1411_s3 = inlined_call_operand.vmem [shape: bf16[32,256], index: 3, kind: input, shape index: {}]   ;;  %s1412_s4 = inlined_call_operand.vmem [shape: f32[1,256], index: 4, kind: input, shape index: {}]   ;;  %s1413_s5 = inlined_call_operand.vmem [shape: bf16[256,32], index: 5, kind: input, shape index: {}]   ;;  %s1414_s6 = inlined_call_operand.vmem [shape: f32[1,32], index: 6, kind: input, shape index: {}]   ;;  %s1415_s7 = inlined_call_operand.vmem [shape: bf16[8,32], index: 7, kind: input, shape index: {}]   ;;  %s1416_s8 = inlined_call_operand.vmem [shape: f32[8,1], index: 8, kind: input, shape index: {}]   ;;  %s1417_s9 = inlined_call_operand.hbm [shape: f32[32,256], index: 9, kind: output, shape index: {0}]   ;;  %s1418_s10 = inlined_call_operand.hbm [shape: f32[4,1,8], index: 10, kind: output, shape index: {1}]  }
   0x1   :  { %1419 = sst [smem:[#allocation8_spill]] %s1408_s0 }
   0x2   :  { %1420 = sst [smem:[#allocation9_spill]] %s1409_s1 }
   0x3   :  { %16 = vsyncpa [#allocation3], 0 }
   0x4   :  { %18 = vsyncpa [#allocation3 + $0x1], 0 }
   0x5   :  { %19 = vsyncpa [#allocation5], 0 }
   0x6   :  { %21 = vsyncpa [#allocation5 + $0x1], 0  ;;  %s1196_s13 = smov 0   ;;  %s1198_s14 = smov 0  }
   0x7   :  { %s1200_s15 = smov 0   ;;  %s1202_s16 = smov 0  }
   0x8 LB: > { %s1217_s17 = sadd.s32 4294967295, %s1134_s16   ;;  %s879_s18 = sadd.s32 4294967294, %s1134_s16   ;;  %s1134_s16 = sphi %s1202_s16, %s1428_s16   ;;  %s1130_s15 = sphi %s1200_s15, %s1427_s15   ;;  %s1126_s14 = sphi %s1198_s14, %s1426_s14   ;;  %s1122_s13 = sphi %s1196_s13, %s1425_s13  }
   0x9   : > { %s1221_s19 = sadd.s32 1, %s1134_s16   ;;  %s228_s20 = sadd.s32 1, %s1130_s15 }
   0xa   : > { %s225_s21 = ssub.s32 %s1134_s16, %s1221_s19  ;;  %p238_p0 = scmp.ne.s32.totalorder %s1130_s15, %s1126_s14 }
   0xb   : > { %p226_p1 = scmp.eq.s32.totalorder %s225_s21, 0  ;;  %p239_p2 = scmp.eq.s32.totalorder %s1217_s17, 3 }
   0xc   : > { %p244_p3 = scmp.ne.s32.totalorder %s1126_s14, %s1122_s13  ;;  %p245_p4 = scmp.eq.s32.totalorder %s879_s18, 3 }
   0xd   : > { %s1232_s22 = scalar_select %p226_p1, %s1130_s15, %s228_s20  }
   0xe   : > { %p1234_p5 = por %p239_p2, %p238_p0  ;;  %p1238_p6 = por %p245_p4, %p244_p3 }
   0xf   : > { %p882_p7 = scmp.ge.s32.totalorder %s1134_s16, 1  ;;  %p320_p8 = scmp.lt.s32.totalorder %s1134_s16, 5 }
  0x11   : > { %p321_p9 = pnand %p882_p7, %p320_p8 }
  0x12   : > { %s1423_s1 = sld [smem:[#allocation9_spill]] (!%p321_p9)  ;;  %vm379_vm0 = vcmask (!%p321_p9), 1043456   ;;  %p361_p10 = scmp.lt.s32.totalorder (!%p321_p9), %s1217_s17, 3  ;;  %v1136_v1 = vmov (!%p321_p9), 0.0   ;;  %vm1137_vm1 = vmmov (!%p321_p9), 0   ;;  %vm375_vm2 = vcmask (!%p321_p9), 64512  }
  0x13   : > { %324 = sbr.rel (%p321_p9) target bundleno = 976 (0x3d0), region = 56  ;;  %946 = vmatprep.subr.bf16.mxu1 (!%p321_p9), %v1136_v1  ;;  %948 = vmatprep.mubr.msk.bf16.mxu1 (!%p321_p9), %vm1137_vm1, %v1136_v1  ;;  %v1006_v3 = vld [vmem:[%s1411_s3] ss:$8 sps:$4 sm:$0xff] (!%p321_p9)   ;;  %v1008_v4 = vld [vmem:[%s1411_s3 + $0x4] ss:$8 sps:$4 sm:$0xff] (!%p321_p9)   ;;  %s1424_s0 = sld [smem:[#allocation8_spill]] (!%p321_p9)  ;;  %v431_v33 = vlaneseq (!%p321_p9) }
  0x14   : > { %v1011_v6 = vld [vmem:[%s1411_s3 + $0x14] ss:$8 sps:$4 sm:$0xff] (!%p321_p9)   ;;  %v1009_v7 = vld [vmem:[%s1411_s3 + $0x10] ss:$8 sps:$4 sm:$0xff] (!%p321_p9)   ;;  %v1138_v8 = vmov (!%p321_p9), 0   ;;  %vm461_vm3 = vcmask (!%p321_p9), 261120  }
  0x15   : > { %1005 = vset.pattern.permute.xlu0 (!%p321_p9), %v1138_v8  ;;  %v885_v9 = vld [vmem:[%s1410_s2] ss:$0 sm:$0xff] (!%p321_p9)  ;;  %v1014_v19 = vld [vmem:[%s1413_s5 + $0x48] sm:$0xff] (!%p321_p9)   ;;  %v1016_v21 = vld [vmem:[%s1413_s5 + $0x50] sm:$0xff] (!%p321_p9)   ;;  %v432_v34 = vshrl.u32 (!%p321_p9), %v431_v33, 7  ;;  %s919_s30 = sshll.u32 (!%p321_p9), %s1217_s17, 8 }
  0x16   : > { %v1012_v17 = vld [vmem:[%s1413_s5 + $0x40] sm:$0xff] (!%p321_p9)   ;;  %v1015_v20 = vld [vmem:[%s1413_s5 + $0x8] sm:$0xff] (!%p321_p9)   ;;  %v1017_v22 = vld [vmem:[%s1413_s5 + $0x10] sm:$0xff] (!%p321_p9)  }
  0x17   : > { %v1013_v18 = vld [vmem:[%s1413_s5] sm:$0xff] (!%p321_p9)   ;;  %922 = vmatprep.subr.bf16.mxu0 (!%p321_p9), %v1012_v17  ;;  %v1018_v23 = vld [vmem:[%s1413_s5 + $0x58] sm:$0xff] (!%p321_p9)   ;;  %v1022_v27 = vld [vmem:[%s1413_s5 + $0x68] sm:$0xff] (!%p321_p9)   ;;  %v433_v35 = vsub.s32 (!%p321_p9), 0, %v432_v34  ;;  %v437_v37 = vsub.s32 (!%p321_p9), 1, %v432_v34 }
  0x18   : > { %v367_v0 = vld [vmem:[%s1423_s1] sm:$0xf] (!%p321_p9)  ;;  %923 = vmatpush3.bf16.msra.mxu0 (!%p321_p9), %v1013_v18  ;;  %v1019_v24 = vld [vmem:[%s1413_s5 + $0x18] sm:$0xff] (!%p321_p9)   ;;  %v1023_v28 = vld [vmem:[%s1413_s5 + $0x28] sm:$0xff] (!%p321_p9)  }
  0x19   : > { %v381_v2 = vsel (!%p321_p9), %vm379_vm0, %v367_v0, 0  ;;  %924 = vmatprep.subr.bf16.mxu0 (!%p321_p9), %v1014_v19  ;;  %v1020_v25 = vld [vmem:[%s1413_s5 + $0x60] sm:$0xff] (!%p321_p9)   ;;  %v1024_v29 = vld [vmem:[%s1413_s5 + $0x70] sm:$0xff] (!%p321_p9)   ;;  %v1026_v31 = vld [vmem:[%s1413_s5 + $0x78] sm:$0xff] (!%p321_p9)  }
  0x1a   : > { %947 = vmatpush3.bf16.msra.mxu1 %v381_v2  ;;  %s362_s27 = scalar_select %p361_p10, %s1217_s17, 3  ;;  %v1021_v26 = vld [vmem:[%s1413_s5 + $0x20] sm:$0xff]   ;;  %v1025_v30 = vld [vmem:[%s1413_s5 + $0x30] sm:$0xff]   ;;  %v1027_v32 = vld [vmem:[%s1413_s5 + $0x38] sm:$0xff]  }
  0x1b   : > { %465 = vmatprep.subr.bf16.mxu1 %v1008_v4  ;;  %v429_v36 = vld [vmem:[%s1412_s4] sm:$0x3] }
  0x1c   : > { %s884_s12 = sshll.u32 %s362_s27, 2  ;;  %925 = vmatpush3.bf16.msra.mxu0 %v1015_v20  ;;  %v434_v38 = vrot.slane %v429_v36, %v433_v35  ;;  %v438_v39 = vrot.slane %v429_v36, %v437_v37  ;;  %v700_v56 = vld [vmem:[%s1416_s8] sm:$0xff] }
  0x1d   : > { %s364_s21 = scalar_lea.vmem %s1424_s0, %s884_s12  ;;  %926 = vmatprep.subr.bf16.mxu0 %v1016_v21  ;;  %s1322_s12 = sand.u32 1, %s1126_s14   ;;  %703 = vperm.xlu0 %1005, %v700_v56   ;;  %v894_v58 = vld [vmem:[%s1414_s6] ss:$0 sm:$0xff] }
  0x1e   : > { %v366_v5 = vld [vmem:[%s364_s21] sm:$0xf]  ;;  %s883_s18 = sshll.u32 %s1322_s12, 4  ;;  %s1340_s21 = scalar_lea.hbm %s1417_s9, %s919_s30 }
  0x1f   : > { %949 = vmatmul.mubr.msk.bf16.vlgmr.msra.gmra.mrb[0].mxu1 %vm375_vm2, %v366_v5  ;;  %s354_s20 = scalar_lea.vmem [#allocation2], %s883_s18  ;;  %s761_s26 = scalar_lea.sflag [#allocation3], %s1322_s12 }
  0x20   : > { %466 = vmatpush1.bf16.msra.mxu1 %v1006_v3  ;;  %497 = vmatprep.mubr.bf16.mxu1 %v1138_v8  ;;  %v698_v3 = vld [vmem:[%s1415_s7] sm:$0xf]  ;;  %s779_s25 = sshll.u32 %s354_s20, 4  ;;  %s1139_s0 = smov [#allocation2]   ;;  %s780_s25 = int_to_ptr.vmem [resolvable:$true] %s779_s25 }
  0x21   : > { %467 = vmatprep.subr.bf16.mxu1 %v1011_v6  ;;  %927 = vmatpush3.bf16.msra.mxu0 %v1017_v22  ;;  %s1040_s28 = scalar_lea.vmem %s780_s25, 256  ;;  %s1044_s1 = sshll.u32 %s1139_s0, 4  ;;  %s1045_s1 = int_to_ptr.vmem [resolvable:$false] %s1044_s1 }
  0x22   : > { %928 = vmatprep.subr.bf16.mxu0 %v1018_v23  ;;  %p1041_p11 = scmp.ne.s32.totalorder %s780_s25, %s1040_s28  ;;  %s1046_s29 = scalar_lea.vmem %s1045_s1, 512 }
  0x23   : > { %p1047_p0 = scmp.lt.s32.totalorder %s780_s25, %s1045_s1  ;;  %p1048_p1 = scmp.lt.s32.totalorder %s1046_s29, %s1040_s28 }
  0x24   : > { %468 = vmatpush1.bf16.msra.mxu1 %v1009_v7  ;;  %p1042_p12 = pnand %p1041_p11, %p1234_p5 }
  0x25   : > { %952 = vmatprep.subr.bf16.mxu1 %v1136_v1  ;;  %929 = vmatpush3.bf16.msra.mxu0 %v1019_v24  ;;  %p1049_p2 = por %p1048_p1, %p1047_p0 }
  0x26   : > { %930 = vmatprep.subr.bf16.mxu0 %v1020_v25  ;;  %p1043_p13 = pneg %p1042_p12 }
  0x28   : > { %p1050_p3 = pnand %p1049_p2, %p1043_p13 }
  0x29   : > { %931 = vmatpush3.bf16.msra.mxu0 %v1021_v26 }
  0x2a   : > { %932 = vmatprep.subr.bf16.mxu0 %v1022_v27 }
  0x2d   : > { %933 = vmatpush3.bf16.msra.mxu0 %v1023_v28 }
  0x2e   : > { %934 = vmatprep.subr.bf16.mxu0 %v1024_v29 }
  0x31   : > { %935 = vmatpush3.bf16.msra.mxu0 %v1025_v30 }
  0x32   : > { %936 = vmatprep.subr.bf16.mxu0 %v1026_v31 }
  0x35   : > { %937 = vmatpush3.bf16.msra.mxu0 %v1027_v32 }
  0xf2   : > { %v417_v10 = vpop.f32.mrb[0].mxu1 }
  0xf3   : > { %v418_v11 = vadd.f32 %v885_v9, %v417_v10  ;;  %v950_v12 = vpop.f32.mrb[1].mxu1 }
  0xf4   : > { %v420_v13 = vpop.f32.mrb[2].mxu1 }
  0xf5   : > { %v423_v14 = vmax.f32 %v418_v11, 0.0  ;;  %v951_v15 = vpop.f32.mrb[3].mxu1 }
  0xf7   : > { %v424_v16 = vpack.c.bf16 %v423_v14, %v423_v14 }
  0xf9   : > { %891 = vmatmul.mubr.msk.bf16.vlgmr.msra.gmra.mrb[4].mxu1 %vm461_vm3, %v424_v16 }
  0xfa   : > { %954 = vmatprep.mubr.msk.bf16.mxu1 %vm1137_vm1, %v1136_v1 }
 0x1cc   : > { %v499_v40 = vpop.f32.mrb[4].mxu1 }
 0x1cd   : > { %v500_v41 = vadd.f32 %v499_v40, %v434_v38  ;;  %v501_v42 = vpop.f32.mrb[5].mxu1 }
 0x1ce   : > { %v502_v43 = vadd.f32 %v501_v42, %v438_v39  ;;  %v503_v44 = vpop.f32.mrb[6].mxu1 }
 0x1cf   : > { %v892_v45 = vmul.f32 -1.442695, %v500_v41  ;;  %v504_v46 = vpop.f32.mrb[7].mxu1 }
 0x1d0   : > { %v893_v47 = vmul.f32 -1.442695, %v502_v43 }
 0x1d1   : > { %1028 = vpow2.f32 %v892_v45 }
 0x1d2   : > { %1030 = vpow2.f32 %v893_v47 }
 0x1db   : > { %v1029_v48 = vpop.eup %1028 }
 0x1dc   : > { %v1031_v49 = vpop.eup %1030  ;;  %v512_v50 = vadd.f32 1.0, %v1029_v48 }
 0x1dd   : > { %v513_v51 = vadd.f32 1.0, %v1031_v49 }
 0x1de   : > { %1032 = vrcp.f32 %v512_v50 }
 0x1df   : > { %1034 = vrcp.f32 %v513_v51 }
 0x1e8   : > { %v1033_v52 = vpop.eup %1032 }
 0x1e9   : > { %v1035_v53 = vpop.eup %1034  ;;  %518 = vst [vmem:[%s354_s20] sm:$0xff] %v1033_v52  ;;  %v520_v55 = vpack.c.bf16 %v1033_v52, %v1033_v52 }
 0x1ea   : > { %v521_v54 = vpack.c.bf16 %v1035_v53, %v1035_v53  ;;  %519 = vst [vmem:[%s354_s20 + $0x8] sm:$0xff] %v1035_v53 }
 0x1ec   : > { %689 = vmatprep.mubr.bf16.mxu0 %v521_v54 }
 0x1ed   : > { %690 = vmatmul.mubr.bf16.vlgmr.msra.gmra.mrb[0].mxu0 %v520_v55 }
 0x2c0   : > { %v938_v57 = vpop.f32.mrb[0].mxu0 }
 0x2c1   : > { %v939_v59 = vpop.f32.mrb[1].mxu0 }
 0x2c2   : > { %v940_v60 = vadd.f32 %v939_v59, %v938_v57  ;;  %v941_v61 = vpop.f32.mrb[2].mxu0 }
 0x2c3   : > { %v942_v62 = vpop.f32.mrb[3].mxu0 }
 0x2c4   : > { %v692_v63 = vadd.f32 %v940_v60, %v894_v58 }
 0x2c6   : > { %v697_v0 = vmax.f32 %v692_v63, 0.0 }
 0x2c8   : > { %v699_v1 = vpack.c.bf16 %v697_v0, %v697_v0 }
 0x2ca   : > { %v710_v2 = vsel %vm461_vm3, %v699_v1, 0 }
 0x2cb   : > { %953 = vmatpush3.bf16.xpose.msra.mxu1 %v710_v2 }
 0x2d2   : > { %955 = vmatmul.mubr.msk.bf16.vlgmr.msra.gmra.mrb[8].mxu1 %vm461_vm3, %v698_v3 }
 0x2d3   : > { %1053 = shalt.err (!%p1050_p3)
}
 0x2d4   : > { %s1054_s20 = scalar_lea.hbm %s1340_s21, 256  ;;  %s1058_s0 = scalar_lea.hbm %s1417_s9, 1024 }
 0x2d5   : > { %p1055_p4 = scmp.ne.s32.totalorder %s1340_s21, %s1054_s20  ;;  %p1059_p9 = scmp.lt.u32.totalorder %s1340_s21, %s1417_s9 }
 0x2d6   : > { %p1060_p10 = scmp.lt.u32.totalorder %s1058_s0, %s1054_s20  ;;  %p1062_p12 = scmp.lt.u32.totalorder %s1054_s20, %s1340_s21 }
 0x2d7   : > { %p1056_p7 = pnand %p1055_p4, %p1234_p5 }
 0x2d8   : > { %p1061_p11 = por %p1060_p10, %p1059_p9 }
 0x2d9   : > { %p1057_p8 = pneg %p1056_p7 }
 0x2da   : > { %p1063_p13 = por %p1062_p12, %p1061_p11 }
 0x2dc   : > { %p1064_p0 = pnand %p1063_p13, %p1057_p8 }
 0x2de   : > { %1067 = shalt.err (!%p1064_p0)
}
 0x2df   : > { %958 = dma.vmem_to_hbm [thread:$0]  (%p1234_p5), %s780_s25, 256, %s1340_s21, %s761_s26   ;;  %v704_v4 = vpop.permute.xlu0 %703  ;;  %vm758_vm4 = vcmask 57344  }
 0x2e0   : > { %s916_s18 = sshll.u32 %s1217_s17, 4  ;;  %s360_s28 = scalar_lea.vmem [#allocation4], %s1322_s12 }
 0x2e1   : > { %s792_s29 = sshll.u32 %s360_s28, 4  ;;  %s1365_s21 = scalar_lea.hbm %s1418_s10, %s916_s18  ;;  %s1367_s29 = int_to_ptr.vmem [resolvable:$true] %s792_s29 }
 0x2e2   : > { %s766_s25 = scalar_lea.sflag [#allocation5], %s1322_s12  ;;  %s1068_s26 = scalar_lea.vmem %s1367_s29, 16 }
 0x2e3   : > { %p1069_p1 = scmp.ne.s32.totalorder %s1367_s29, %s1068_s26  ;;  %s1140_s17 = smov [#allocation4]  }
 0x2e4   : > { %s1072_s30 = sshll.u32 %s1140_s17, 4  ;;  %s1073_s30 = int_to_ptr.vmem [resolvable:$false] %s1072_s30 }
 0x2e5   : > { %p1070_p2 = pnand %p1069_p1, %p1234_p5  ;;  %s1074_s0 = scalar_lea.vmem %s1073_s30, 32 }
 0x2e6   : > { %p1075_p4 = scmp.lt.s32.totalorder %s1367_s29, %s1073_s30  ;;  %p1076_p7 = scmp.lt.s32.totalorder %s1074_s0, %s1068_s26 }
 0x2e7   : > { %p1071_p3 = pneg %p1070_p2 }
 0x2e8   : > { %p1077_p8 = por %p1076_p7, %p1075_p4 }
 0x2ea   : > { %p1078_p9 = pnand %p1077_p8, %p1071_p3 }
 0x3a5   : > { %v746_v5 = vpop.f32.mrb[8].mxu1 }
 0x3a6   : > { %v747_v6 = vadd.f32 %v746_v5, %v704_v4  ;;  %v956_v7 = vpop.f32.mrb[9].mxu1 }
 0x3a7   : > { %v749_v8 = vpop.f32.mrb[10].mxu1 }
 0x3a8   : > { %v912_v9 = vmul.f32 -1.442695, %v747_v6  ;;  %v957_v10 = vpop.f32.mrb[11].mxu1 }
 0x3aa   : > { %1036 = vpow2.f32 %v912_v9 }
 0x3b4   : > { %v1037_v11 = vpop.eup %1036 }
 0x3b5   : > { %v755_v12 = vadd.f32 1.0, %v1037_v11 }
 0x3b7   : > { %1038 = vrcp.f32 %v755_v12 }
 0x3c1   : > { %v1039_v13 = vpop.eup %1038 }
 0x3c2   : > { %759 = vst.msk [vmem:[%s360_s28] sm:$0x1] %vm758_vm4, %v1039_v13 }
 0x3c3   : > { %1081 = shalt.err (!%p1078_p9)
}
 0x3c4   : > { %s1082_s12 = scalar_lea.hbm %s1365_s21, 16  ;;  %s1086_s18 = scalar_lea.hbm %s1418_s10, 64 }
 0x3c5   : > { %p1083_p10 = scmp.ne.s32.totalorder %s1365_s21, %s1082_s12  ;;  %p1087_p13 = scmp.lt.u32.totalorder %s1365_s21, %s1418_s10 }
 0x3c6   : > { %p1088_p0 = scmp.lt.u32.totalorder %s1086_s18, %s1082_s12  ;;  %p1090_p2 = scmp.lt.u32.totalorder %s1082_s12, %s1365_s21 }
 0x3c7   : > { %p1084_p11 = pnand %p1083_p10, %p1234_p5 }
 0x3c8   : > { %p1089_p1 = por %p1088_p0, %p1087_p13 }
 0x3c9   : > { %p1085_p12 = pneg %p1084_p11 }
 0x3ca   : > { %p1091_p3 = por %p1090_p2, %p1089_p1 }
 0x3cc   : > { %p1092_p4 = pnand %p1091_p3, %p1085_p12 }
 0x3ce   : > { %1095 = shalt.err (!%p1092_p4)
}
 0x3cf   : > { %959 = dma.vmem_to_hbm [thread:$0]  (%p1234_p5), %s1367_s29, 16, %s1365_s21, %s766_s25  }
 0x3d0 PF: > { %p969_p7 = scmp.ge.s32.totalorder %s1134_s16, 2  ;;  %s804_s27 = sand.u32 1, %s1122_s13  }
 0x3d1   : > { %s805_s26 = scalar_lea.sflag [#allocation3], %s804_s27 }
 0x3d2   : > { %p963_p8 = pnand %p969_p7, %p1238_p6 }
 0x3d4   : > { %1113 = dma.done.wait (!%p963_p8), %s805_s26, 256  }
 0x3d5   : > { %1115 = vsyncadd (!%p963_p8), %s805_s26, 4294967040  ;;  %s814_s17 = scalar_lea.sflag [#allocation5], %s804_s27 }
 0x3d6   : > { %1117 = dma.done.wait (!%p963_p8), %s814_s17, 16  }
 0x3d7   : > { %1119 = vsyncadd (!%p963_p8), %s814_s17, 4294967280  ;;  %p24_p5 = scmp.ge.s32.totalorder %s1221_s19, 6   ;;  %s1425_s13 = smov %s1126_s14 }
 0x3d8   : > { %s1426_s14 = smov %s1130_s15  ;;  %s1427_s15 = smov %s1232_s22 }
 0x3d9   : > { %s1428_s16 = smov %s1221_s19  ;;  %26 = sbr.rel (!%p24_p5) target bundleno = 8 (0x8), region = 108 }
 0x3e0   :  { %818 = vsyncpa [#allocation3], 1 }
 0x3e1   :  { %820 = vsyncpa [#allocation3 + $0x1], 1 }
 0x3e2   :  { %821 = vsyncpa [#allocation5], 1 }
 0x3e3   :  { %823 = vsyncpa [#allocation5 + $0x1], 1 }

</bundles_post_ra>
